<compile_context>
chip_gen: v7x
topology: tpu7x:2x2x1
jax: 0.10.0
libtpu: 0.0.40
codegen_flags: <defaults>
</compile_context>

<pallas_src>
import functools

import jax
import jax.numpy as jnp
from jax.experimental import pallas as pl
from jax.experimental.pallas import tpu as pltpu

IN_FEATURES = 65536
OUT_FEATURES = 1

LANES = 128          # lane width of a vreg
K_CHUNK = 1024       # 8 vreg columns of the reduction axis per loop step


def _cdiv(a, b):
    return (a + b - 1) // b


def _round_up(a, m):
    return ((a + m - 1) // m) * m


def logreg_kernel(x_ref, w_ref, b_ref, o_ref):
    # x_ref: (tb, K) f32 VMEM tile; w_ref: (1, K) f32 VMEM (resident, constant
    # block index); b_ref: (1, 1) f32 SMEM; o_ref: (tb, 1) f32.
    tb, K = x_ref.shape
    cols = K_CHUNK // LANES
    n_chunks = K // K_CHUNK

    def body(c, acc):
        base = pl.multiple_of(c * K_CHUNK, K_CHUNK)
        xk = x_ref[:, pl.ds(base, K_CHUNK)]          # (tb, K_CHUNK)
        wk = w_ref[:, pl.ds(base, K_CHUNK)]          # (1,  K_CHUNK), bcast
        prod = xk * wk                               # VPU elementwise
        # Fold the chunk's vreg columns into the (tb, 128) accumulator with
        # static, 128-aligned lane slices: pure VALU adds, no XLU traffic and
        # no (tb, K) f32 temporary materialized in VMEM.
        for j in range(cols):
            acc = acc + prod[:, j * LANES:(j + 1) * LANES]
        return acc

    acc = jax.lax.fori_loop(
        0, n_chunks, body, jnp.zeros((tb, LANES), jnp.float32))

    # Single cross-lane (XLU) reduce per 8-row group, bias add, EUP sigmoid.
    z = jnp.sum(acc, axis=-1, keepdims=True) + b_ref[0, 0]
    o_ref[...] = jax.nn.sigmoid(z).astype(o_ref.dtype)


def _choose_batch_tile(B, K, vmem_budget_bytes):
    """Pick a sublane-aligned batch tile that fits the VMEM budget but still
    yields >=2 grid steps (>=4 for larger batches) for megacore + pipelining."""
    row_bytes = K * 4
    # Reserve the (up to double-buffered) resident weight row before sizing
    # the double-buffered x tiles.
    avail = max(vmem_budget_bytes - 2 * row_bytes, 2 * row_bytes)
    rows_fit = max(8, ((avail // (2 * row_bytes)) // 8) * 8)
    if B <= 8:
        # Tile equals the full batch dim (satisfies the layout rule); a single
        # grid step is unavoidable here.
        return B
    min_steps = 4 if B >= 32 else 2
    tb = min(rows_fit, _round_up(_cdiv(B, min_steps), 8))
    return max(8, tb)


@functools.partial(jax.jit, static_argnames=("vmem_budget_bytes",))
def logistic_regression(x, w, b, *, vmem_budget_bytes=16 * 1024 * 1024):
    """sigmoid(x @ W^T + b).

    x: (B, 65536) f32; w: (1, 65536) f32 (PyTorch Linear layout; (65536, 1)
    also accepted); b: (1,) / (1, 1) f32.
    """
    B, K = x.shape
    assert K % K_CHUNK == 0, "feature dim must be a multiple of K_CHUNK"

    w_row = w.reshape(1, K)      # contiguous, lane-dense weight row
    b_sc = b.reshape(1, 1)

    # Portable budget: cap so the scoped request also fits v7x's 64 MiB VMEM;
    # 6-8 MiB of x per step already saturates the HBM DMA roofline everywhere.
    budget = min(int(vmem_budget_bytes), 40 * 1024 * 1024)
    tb = _choose_batch_tile(B, K, budget)
    grid = (_cdiv(B, tb),)

    # Scoped VMEM actually requested: double-buffered x tile + (<=2) weight
    # row buffers + output buffers + headroom for internal scratch / spills.
    vmem_limit = 2 * tb * K * 4 + 2 * K * 4 + 4 * tb * 4 + (4 << 20)

    # Weight block index is constant across the grid -> single buffer is
    # enough; fall back to the default (double-buffered) spec if unsupported.
    try:
        w_spec = pl.BlockSpec((1, K), lambda i: (0, 0),
                              pipeline_mode=pl.Buffered(1))
    except Exception:  # pragma: no cover - older BlockSpec signature
        w_spec = pl.BlockSpec((1, K), lambda i: (0, 0))

    return pl.pallas_call(
        logreg_kernel,
        out_shape=jax.ShapeDtypeStruct((B, OUT_FEATURES), jnp.float32),
        grid=grid,
        in_specs=[
            pl.BlockSpec((tb, K), lambda i: (i, 0)),            # x batch tile
            w_spec,                                             # weight row
            pl.BlockSpec(memory_space=pltpu.MemorySpace.SMEM),  # bias scalar
        ],
        out_specs=pl.BlockSpec((tb, OUT_FEATURES), lambda i: (i, 0)),
        compiler_params=pltpu.CompilerParams(
            dimension_semantics=("parallel",),   # batch axis -> both TCs
            vmem_limit_bytes=int(vmem_limit),
        ),
    )(x, w_row, b_sc)


if __name__ == "__main__":
    key = jax.random.PRNGKey(0)
    kx, kw, kb, kx2 = jax.random.split(key, 4)

    # Deterministic synthetic params matching nn.Linear(65536, 1), using
    # PyTorch's default uniform(-1/sqrt(fan_in), 1/sqrt(fan_in)) init range.
    bound = 1.0 / (IN_FEATURES ** 0.5)
    w = jax.random.uniform(
        kw, (OUT_FEATURES, IN_FEATURES), dtype=jnp.float32,
        minval=-bound, maxval=bound)
    b = jax.random.uniform(
        kb, (OUT_FEATURES,), dtype=jnp.float32, minval=-bound, maxval=bound)

    def ref_fn(x):
        return jax.nn.sigmoid(x @ w.T + b)

    # Case 1: tiny batch (single grid step, block == full batch dim).
    B1 = 2
    x1 = jax.random.normal(kx, (B1, IN_FEATURES), dtype=jnp.float32)
    out1 = jax.block_until_ready(logistic_regression(x1, w, b))
    assert out1.shape == (B1, OUT_FEATURES)
    assert jnp.allclose(out1, ref_fn(x1), atol=2e-5, rtol=2e-5)

    # Case 2: batch large enough to exercise the multi-step parallel pipeline
    # with a ragged last tile (B=20 -> tb=16, grid=(2,)).
    B2 = 20
    x2 = jax.random.normal(kx2, (B2, IN_FEATURES), dtype=jnp.float32)
    out2 = jax.block_until_ready(logistic_regression(x2, w, b))
    assert out2.shape == (B2, OUT_FEATURES)
    assert jnp.allclose(out2, ref_fn(x2), atol=2e-5, rtol=2e-5)

    print("KERNEL_OK")
</pallas_src>

<mosaic_0001>
module attributes {stable_mosaic.version = 11 : i64} {
  func.func @logreg_kernel(%arg0: i32, %arg1: memref<2x65536xf32, #tpu.memory_space<vmem>>, %arg2: memref<1x65536xf32, #tpu.memory_space<vmem>>, %arg3: memref<1x1xf32, #tpu.memory_space<smem>>, %arg4: memref<2x1xf32, #tpu.memory_space<vmem>>) attributes {dimension_semantics = [#tpu.dimension_semantics<parallel>], iteration_bounds = array<i64: 1>, scalar_prefetch = 0 : i64, scratch_operands = 0 : i64, tpu.core_type = #tpu.core_type<tc>, window_params = [{transform_indices = @transform_0, window_bounds = array<i64: 2, 65536>}, {pipeline_mode = #tpu.pipeline_mode<synchronous>, transform_indices = @transform_1, window_bounds = array<i64: 1, 65536>}, {transform_indices = @transform_2, window_bounds = array<i64: 1, 1>}, {transform_indices = @transform_3, window_bounds = array<i64: 2, 1>}]} {
    %cst = arith.constant 0.000000e+00 : f32
    %0 = vector.broadcast %cst : f32 to vector<2x128xf32>
    %c0_i32 = arith.constant 0 : i32
    %c64_i32 = arith.constant 64 : i32
    %1 = arith.addi %c0_i32, %c64_i32 : i32
    %c1_i32 = arith.constant 1 : i32
    %2 = scf.for %arg5 = %c0_i32 to %1 step %c1_i32 iter_args(%arg6 = %0) -> (vector<2x128xf32>)  : i32 {
      %c1024_i32 = arith.constant 1024 : i32
      %14 = arith.muli %arg5, %c1024_i32 : i32
      %15 = tpu.assume_multiple %14, 1024 : i32
      %c0_6 = arith.constant 0 : index
      %16 = arith.index_cast %15 : i32 to index
      %17 = vector.load %arg1[%c0_6, %16] : memref<2x65536xf32, #tpu.memory_space<vmem>>, vector<2x1024xf32>
      %c0_7 = arith.constant 0 : index
      %18 = arith.index_cast %15 : i32 to index
      %19 = vector.load %arg2[%c0_7, %18] : memref<1x65536xf32, #tpu.memory_space<vmem>>, vector<1x1024xf32>
      %20 = vector.broadcast %19 : vector<1x1024xf32> to vector<2x1024xf32>
      %21 = arith.mulf %17, %20 : vector<2x1024xf32>
      %22 = vector.extract_strided_slice %21 {offsets = [0, 0], sizes = [2, 128], strides = [1, 1]} : vector<2x1024xf32> to vector<2x128xf32>
      %23 = arith.addf %arg6, %22 : vector<2x128xf32>
      %24 = vector.extract_strided_slice %21 {offsets = [0, 128], sizes = [2, 128], strides = [1, 1]} : vector<2x1024xf32> to vector<2x128xf32>
      %25 = arith.addf %23, %24 : vector<2x128xf32>
      %26 = vector.extract_strided_slice %21 {offsets = [0, 256], sizes = [2, 128], strides = [1, 1]} : vector<2x1024xf32> to vector<2x128xf32>
      %27 = arith.addf %25, %26 : vector<2x128xf32>
      %28 = vector.extract_strided_slice %21 {offsets = [0, 384], sizes = [2, 128], strides = [1, 1]} : vector<2x1024xf32> to vector<2x128xf32>
      %29 = arith.addf %27, %28 : vector<2x128xf32>
      %30 = vector.extract_strided_slice %21 {offsets = [0, 512], sizes = [2, 128], strides = [1, 1]} : vector<2x1024xf32> to vector<2x128xf32>
      %31 = arith.addf %29, %30 : vector<2x128xf32>
      %32 = vector.extract_strided_slice %21 {offsets = [0, 640], sizes = [2, 128], strides = [1, 1]} : vector<2x1024xf32> to vector<2x128xf32>
      %33 = arith.addf %31, %32 : vector<2x128xf32>
      %34 = vector.extract_strided_slice %21 {offsets = [0, 768], sizes = [2, 128], strides = [1, 1]} : vector<2x1024xf32> to vector<2x128xf32>
      %35 = arith.addf %33, %34 : vector<2x128xf32>
      %36 = vector.extract_strided_slice %21 {offsets = [0, 896], sizes = [2, 128], strides = [1, 1]} : vector<2x1024xf32> to vector<2x128xf32>
      %37 = arith.addf %35, %36 : vector<2x128xf32>
      scf.yield %37 : vector<2x128xf32>
    }
    %c64_i32_0 = arith.constant 64 : i32
    %cst_1 = arith.constant dense<0.000000e+00> : vector<2xf32>
    %3 = vector.multi_reduction <add>, %2, %cst_1 [1] : vector<2x128xf32> to vector<2xf32>
    %4 = vector.shape_cast %3 : vector<2xf32> to vector<2x1xf32>
    %c0 = arith.constant 0 : index
    %c0_2 = arith.constant 0 : index
    %5 = memref.load %arg3[%c0, %c0_2] : memref<1x1xf32, #tpu.memory_space<smem>>
    %6 = vector.broadcast %5 : f32 to vector<2x1xf32>
    %7 = arith.addf %4, %6 : vector<2x1xf32>
    %8 = arith.negf %7 : vector<2x1xf32>
    %9 = math.exp %8 : vector<2x1xf32>
    %cst_3 = arith.constant 1.000000e+00 : f32
    %10 = vector.broadcast %cst_3 : f32 to vector<2x1xf32>
    %11 = arith.addf %10, %9 : vector<2x1xf32>
    %12 = arith.divf %10, %11 : vector<2x1xf32>
    %c0_4 = arith.constant 0 : index
    %c0_5 = arith.constant 0 : index
    %13 = vector.load %arg4[%c0_4, %c0_5] : memref<2x1xf32, #tpu.memory_space<vmem>>, vector<2x1xf32>
    tpu.vector_store %arg4[%c0_4, %c0_5], %12 {strides = array<i32>} : memref<2x1xf32, #tpu.memory_space<vmem>>, vector<2x1xf32>,
    return
  }
  func.func @transform_0(%arg0: i32) -> (i32, i32) {
    %c0_i32 = arith.constant 0 : i32
    %c0_i32_0 = arith.constant 0 : i32
    return %arg0, %c0_i32 : i32, i32
  }
  func.func @transform_1(%arg0: i32) -> (i32, i32) {
    %c0_i32 = arith.constant 0 : i32
    %c0_i32_0 = arith.constant 0 : i32
    %c0_i32_1 = arith.constant 0 : i32
    return %c0_i32, %c0_i32_0 : i32, i32
  }
  func.func @transform_2(%arg0: i32) -> (i32, i32) {
    %c0_i32 = arith.constant 0 : i32
    %c0_i32_0 = arith.constant 0 : i32
    %c0_i32_1 = arith.constant 0 : i32
    return %c0_i32, %c0_i32_0 : i32, i32
  }
  func.func @transform_3(%arg0: i32) -> (i32, i32) {
    %c0_i32 = arith.constant 0 : i32
    %c0_i32_0 = arith.constant 0 : i32
    return %arg0, %c0_i32 : i32, i32
  }
}

</mosaic_0001>

<bundles_post_ra>
// kernel: logistic_regression.1
= control target key start
LH: loop header
LB: loop body
LE: loop exit
PB: predicated region body
PF: predicated region fallthrough
CT: control target
= control target key end

     0   :  { %s337_s0 = inlined_call_operand.hbm [shape: f32[2,65536], index: 0, kind: input, shape index: {}]   ;;  %s338_s1 = inlined_call_operand.hbm [shape: f32[1,65536], index: 1, kind: input, shape index: {}]   ;;  %s339_s2 = inlined_call_operand.<no memory space> [shape: f32[1,1], index: 2, kind: input, shape index: {}]   ;;  %s340_s3 = inlined_call_operand.vmem [shape: f32[2,1], index: 3, kind: output, shape index: {}]  }
   0x1   :  { %8 = sst [smem:[#allocation2]] %s339_s2 }
   0x2   :  { %9 = vsyncpa [#allocation4], 0 }
   0x3   :  { %10 = vsyncpa [#allocation6], 0  ;;  %s270_s14 = smov [#allocation3]   ;;  %s271_s16 = smov [#allocation5]  }
   0x4   :  { %s17_s15 = sshll.u32 %s270_s14, 4  ;;  %s27_s17 = sshll.u32 %s271_s16, 4  ;;  %s18_s15 = int_to_ptr.vmem [resolvable:$true] %s17_s15  ;;  %s28_s17 = int_to_ptr.vmem [resolvable:$true] %s27_s17 }
   0x5   :  { %s206_s20 = scalar_lea.hbm %s337_s0, 16384 }
   0x6   :  { %p207_p0 = scmp.ne.s32.totalorder %s337_s0, %s206_s20  ;;  %p210_p1 = scmp.lt.u32.totalorder %s206_s20, %s337_s0 }
   0x8   :  { %p212_p2 = pnand %p210_p1, %p207_p0 }
   0xa   :  { %215 = shalt.err (!%p212_p2)
}
   0xb   :  { %s216_s2 = scalar_lea.vmem %s18_s15, 16384  ;;  %p221_p4 = scmp.lt.s32.totalorder %s18_s15, %s18_s15 }
   0xc   :  { %p217_p3 = scmp.ne.s32.totalorder %s18_s15, %s216_s2  ;;  %p222_p5 = scmp.lt.s32.totalorder %s216_s2, %s216_s2 }
   0xe   :  { %p223_p6 = por %p222_p5, %p221_p4 }
  0x10   :  { %p224_p7 = pnand %p223_p6, %p217_p3 }
  0x12   :  { %227 = shalt.err (!%p224_p7)
}
  0x13   :  { %20 = dma.hbm_to_vmem [thread:$0]  %s337_s0, 16384, %s18_s15, [#allocation4]  }
  0x14   :  { %s228_s29 = scalar_lea.hbm %s338_s1, 8192 }
  0x15   :  { %p229_p8 = scmp.ne.s32.totalorder %s338_s1, %s228_s29  ;;  %p232_p9 = scmp.lt.u32.totalorder %s228_s29, %s338_s1 }
  0x17   :  { %p234_p10 = pnand %p232_p9, %p229_p8 }
  0x19   :  { %237 = shalt.err (!%p234_p10)
}
  0x1a   :  { %s238_s7 = scalar_lea.vmem %s28_s17, 8192  ;;  %p243_p12 = scmp.lt.s32.totalorder %s28_s17, %s28_s17 }
  0x1b   :  { %p239_p11 = scmp.ne.s32.totalorder %s28_s17, %s238_s7  ;;  %p244_p13 = scmp.lt.s32.totalorder %s238_s7, %s238_s7 }
  0x1d   :  { %p245_p0 = por %p244_p13, %p243_p12 }
  0x1f   :  { %p246_p1 = pnand %p245_p0, %p239_p11 }
  0x21   :  { %249 = shalt.err (!%p246_p1)
}
  0x22   :  { %30 = dma.hbm_to_vmem [thread:$0]  %s338_s1, 8192, %s28_s17, [#allocation6]  }
  0x23   :  { %258 = dma.done.wait [#allocation4], 16384  }
  0x24   :  { %259 = vsyncadd [#allocation4], 4294950912 }
  0x25   :  { %260 = dma.done.wait [#allocation6], 8192  }
  0x26   :  { %261 = vsyncadd [#allocation6], 4294959104  ;;  %v320_v0 = vmov 0.0   ;;  %s322_s9 = smov 0  }
  0x27 LB: > { %v56_v1 = vlaneseq  ;;  %v272_v2 = vmov 1983009808   ;;  %s180_s1 = sshll.u32 %s268_s9, 10  ;;  %s44_s9 = sadd.s32 1, %s268_s9   ;;  %s268_s9 = sphi %s322_s9, %s44_s9   ;;  %v264_v0 = vphi %v320_v0, %v341_v0  }
  0x28   : > { %v91_v3 = vunpack.c.l.s4 %v272_v2  ;;  %s47_s10 = sshra.s32 %s180_s1, 7  ;;  %p41_p2 = scmp.ge.s32.totalorder %s44_s9, 64  }
  0x29   : > { %v57_v4 = vshrl.u32 %v56_v1, 7  ;;  %s181_s11 = sshll.u32 %s47_s10, 1  ;;  %s53_s12 = scalar_lea.vmem [#allocation5], %s47_s10  ;;  %vm148_vm0 = vcmask (%p41_p2), 1041408   ;;  %vm161_vm1 = vcmask (%p41_p2), 1024  }
  0x2a   : > { %v92_v5 = vunpack.c.0.s8 %v91_v3  ;;  %v54_v10 = vld [vmem:[%s53_s12] sm:$0xff]  ;;  %s50_s13 = scalar_lea.vmem [#allocation3], %s181_s11  ;;  %s152_s14 = sld [smem:[#allocation2]] (%p41_p2) }
  0x2b   : > { %v58_v6 = vsub.s32 0, %v57_v4  ;;  %v62_v7 = vsub.s32 1, %v57_v4  ;;  %v66_v8 = vsub.s32 2, %v57_v4  ;;  %v70_v9 = vsub.s32 3, %v57_v4  ;;  %v51_v30 = vld [vmem:[%s50_s13] sm:$0xff]  ;;  %v52_v36 = vld [vmem:[%s50_s13 + $0x8] sm:$0xff] }
  0x2c   : > { %v74_v11 = vsub.s32 4, %v57_v4  ;;  %v78_v12 = vsub.s32 5, %v57_v4  ;;  %v82_v13 = vsub.s32 6, %v57_v4  ;;  %v86_v14 = vsub.s32 7, %v57_v4 }
  0x2d   : > { %v59_v15 = vrot.slane %v54_v10, %v58_v6  ;;  %v63_v16 = vrot.slane %v54_v10, %v62_v7  ;;  %v67_v17 = vrot.slane %v54_v10, %v66_v8  ;;  %v71_v18 = vrot.slane %v54_v10, %v70_v9 }
  0x2e   : > { %v75_v19 = vrot.slane %v54_v10, %v74_v11  ;;  %v79_v20 = vrot.slane %v54_v10, %v78_v12  ;;  %v83_v21 = vrot.slane %v54_v10, %v82_v13  ;;  %v87_v22 = vrot.slane %v54_v10, %v86_v14 }
  0x2f   : > { %v88_v23 = vcombine.low %v59_v15, %v63_v16  ;;  %v89_v24 = vcombine.low %v67_v17, %v71_v18  ;;  %v95_v25 = vsub.s32 %v92_v5, %v57_v4 }
  0x30   : > { %v105_v26 = vcombine.low %v75_v19, %v79_v20  ;;  %v106_v27 = vcombine.low %v83_v21, %v87_v22  ;;  %v153_v53 = vstv (%p41_p2), %s152_s14 }
  0x31   : > { %v96_v28 = vrot.slane %v88_v23, %v95_v25  ;;  %v103_v29 = vrot.slane %v89_v24, %v95_v25 }
  0x32   : > { %v113_v31 = vrot.slane %v105_v26, %v95_v25  ;;  %v120_v32 = vrot.slane %v106_v27, %v95_v25 }
  0x33   : > { %v104_v33 = vcombine.low %v96_v28, %v103_v29 }
  0x34   : > { %v121_v34 = vcombine.low %v113_v31, %v120_v32 }
  0x35   : > { %v124_v35 = vmul.f32 %v104_v33, %v51_v30 }
  0x36   : > { %v125_v40 = vmul.f32 %v121_v34, %v52_v36 }
  0x37   : > { %v126_v37 = vadd.f32 %v264_v0, %v124_v35  ;;  %v128_v38 = vrot.slane %v124_v35, 2  ;;  %v131_v39 = vrot.slane %v124_v35, 4  ;;  %v134_v42 = vrot.slane %v124_v35, 6 }
  0x38   : > { %v139_v45 = vrot.slane %v125_v40, 2  ;;  %v142_v47 = vrot.slane %v125_v40, 4  ;;  %v145_v49 = vrot.slane %v125_v40, 6 }
  0x39   : > { %v130_v41 = vadd.f32 %v128_v38, %v126_v37 }
  0x3b   : > { %v133_v43 = vadd.f32 %v131_v39, %v130_v41 }
  0x3d   : > { %v136_v44 = vadd.f32 %v134_v42, %v133_v43 }
  0x3f   : > { %v137_v46 = vadd.f32 %v136_v44, %v125_v40 }
  0x41   : > { %v141_v48 = vadd.f32 %v139_v45, %v137_v46  ;;  %43 = sbr.rel (!%p41_p2) target bundleno = 39 (0x27), region = 49 }
  0x43   : > { %v144_v50 = vadd.f32 %v142_v47, %v141_v48 }
  0x45   : > { %v147_v51 = vadd.f32 %v145_v49, %v144_v50  }
  0x47   : > { %v341_v0 = vmov %v147_v51  ;;  %v149_v52 = vsel (%p41_p2), %vm148_vm0, %v147_v51, 0.0 }
  0x48   :  { %150 = vadd.xlane.f32.xlu0 %v149_v52 }
  0xd5   :  { %v151_v54 = vpop.xlane.xlu0 %150 }
  0xd6   :  { %v154_v55 = vadd.f32 %v153_v53, %v151_v54 }
  0xd8   :  { %v182_v56 = vmul.f32 -1.442695, %v154_v55 }
  0xda   :  { %202 = vpow2.f32 %v182_v56 }
  0xe4   :  { %v203_v57 = vpop.eup %202 }
  0xe5   :  { %v158_v58 = vadd.f32 1.0, %v203_v57 }
  0xe7   :  { %204 = vrcp.f32 %v158_v58 }
  0xf1   :  { %v205_v59 = vpop.eup %204 }
  0xf2   :  { %162 = vst.msk [vmem:[%s340_s3] sm:$0x3] %vm161_vm1, %v205_v59 }
  0xf3   :  { %167 = vsyncpa [#allocation4], 1 }
  0xf4   :  { %168 = vsyncpa [#allocation6], 1 }

</bundles_post_ra>
